<compile_context>
chip_gen: v6e
topology: v6e:2x2x1
jax: 0.10.0
libtpu: 0.0.40
codegen_flags: <defaults>
</compile_context>

<pallas_src>
import functools

import numpy as np
import jax
import jax.numpy as jnp
from jax import lax
from jax.experimental import pallas as pl
from jax.experimental.pallas import tpu as pltpu


def _cdiv(a, b):
    return -(-a // b)


def _round_up(x, m):
    return _cdiv(x, m) * m


def _pick_tile(extent, tile_max, align):
    """Padding-aware tile: ~extent / ceil(extent / tile_max), aligned."""
    tile_max = max(align, (tile_max // align) * align)
    n_tiles = max(1, _cdiv(extent, tile_max))
    tile = _round_up(_cdiv(extent, n_tiles), align)
    return min(tile, tile_max)


def _tpu_vmem_capacity_bytes():
    try:
        return int(pltpu.get_tpu_info().vmem_capacity_bytes)
    except Exception:
        return 64 * 1024 * 1024  # conservative (v7x-sized) fallback


# ---------------------------------------------------------------------------
# Pass 1: streaming (n_neighbor + 1) smallest squared distances per query row.
# ---------------------------------------------------------------------------
def _kth_kernel(q_ref, xt_ref, xn_ref, cand_ref, *, n_sel, cand_w):
    """
    q_ref   : [m_tile, d_pad]  query tile (f32)
    xt_ref  : [d_pad, n_tile]  pre-transposed data tile (f32)
    xn_ref  : [1, n_tile]      precomputed ||x||^2 row (+inf on padded columns)
    cand_ref: [m_tile, cand_w] output/accumulator: n_sel smallest squared
              distances seen so far, ascending in columns 0 .. n_sel - 1.
    """
    j = pl.program_id(1)  # data-tile index: trailing "arbitrary" reduction axis

    @pl.when(j == 0)
    def _init():
        cand_ref[...] = jnp.full_like(cand_ref, jnp.inf)

    q = q_ref[...]
    qn = jnp.sum(q * q, axis=1, keepdims=True)                        # [m, 1]
    qx = lax.dot_general(q, xt_ref[...], (((1,), (0,)), ((), ())),
                         preferred_element_type=jnp.float32)           # [m, n]
    d2 = jnp.maximum(qn + xn_ref[...] - 2.0 * qx, 0.0)  # squared; read-only

    m_tile = d2.shape[0]
    inf = jnp.float32(jnp.inf)
    lane = lax.broadcasted_iota(jnp.int32, (1, cand_w), 1).astype(jnp.float32)

    old = cand_ref[...]                                  # read-only below
    new0 = jnp.full((m_tile, cand_w), inf, dtype=jnp.float32)
    fill0 = jnp.zeros((m_tile, 1), dtype=jnp.float32)
    prev0 = jnp.full((m_tile, 1), -1.0, dtype=jnp.float32)  # d2 >= 0 always

    # Non-destructive selection: pop the row-minimum strictly greater than the
    # previously popped value (all ties at once, with multiplicity) from
    # {old candidates} U {this tile}, appending it via a lane-index mask.
    # d2 / old never get mutated, so the loop carries only small arrays.
    def body(_, carry):
        prev, new, fill = carry
        rmin = jnp.minimum(
            jnp.min(jnp.where(d2 > prev, d2, inf), axis=1, keepdims=True),
            jnp.min(jnp.where(old > prev, old, inf), axis=1, keepdims=True))
        cnt = (jnp.sum((d2 == rmin).astype(jnp.float32), axis=1, keepdims=True)
               + jnp.sum((old == rmin).astype(jnp.float32), axis=1, keepdims=True))
        put = (lane >= fill) & (lane < fill + cnt)                     # [m, cand_w]
        new = jnp.where(put, rmin, new)
        return rmin, new, fill + cnt

    unroll = n_sel if n_sel <= 8 else 8
    _, cand_new, _ = lax.fori_loop(0, n_sel, body, (prev0, new0, fill0),
                                   unroll=unroll)
    cand_ref[...] = cand_new


# ---------------------------------------------------------------------------
# Pass 2: int8 membership mask, d2 < kth2 (same d2 formula as pass 1).
# ---------------------------------------------------------------------------
def _mask_kernel(q_ref, xt_ref, xn_ref, cand_ref, mask_ref, *, n_neighbor):
    q = q_ref[...]
    qn = jnp.sum(q * q, axis=1, keepdims=True)
    qx = lax.dot_general(q, xt_ref[...], (((1,), (0,)), ((), ())),
                         preferred_element_type=jnp.float32)
    d2 = jnp.maximum(qn + xn_ref[...] - 2.0 * qx, 0.0)
    kth2 = cand_ref[:, n_neighbor:n_neighbor + 1]                      # [m, 1]
    mask_ref[...] = (d2 < kth2).astype(jnp.int8)


# ---------------------------------------------------------------------------
# Wrapper: FixedNeighborSearch.forward(data, queries, n_neighbor)
# ---------------------------------------------------------------------------
def fixed_neighbor_search(data, queries, n_neighbor):
    data = jnp.asarray(data)
    queries = jnp.asarray(queries)
    n, d = data.shape
    m, dq = queries.shape
    if d != dq:
        raise ValueError("data and queries must have the same feature dim")
    n_neighbor = int(n_neighbor)
    if n_neighbor < 0 or n_neighbor + 1 > n:
        raise ValueError(
            f"n_neighbor={n_neighbor} requires at least n_neighbor+1 data points (n={n})")

    n_sel = n_neighbor + 1
    cand_w = max(128, _round_up(n_sel, 128))
    d_pad = _round_up(d, 8)
    cap = _tpu_vmem_capacity_bytes()

    # ---- Decoupled, padding-aware tiling (pass 1 vs pass 2) ----
    # Pass 2 (HBM-bound int8 mask): large tiles so the per-step pipeline
    # overhead is amortized against the output writeback.
    m_tile2 = _pick_tile(m, 256, 32)        # int8 output: 32-sublane aligned
    n_tile2 = _pick_tile(n, 8192, 128)
    M = _round_up(m, m_tile2)
    N2 = _round_up(n, n_tile2)
    # Pass 1 (selection-loop bound): same m granularity, but make sure the
    # "parallel" axis has >= 2 tiles so both v7x TensorCores get work.
    m_tile1 = m_tile2
    while M // m_tile1 < 2 and m_tile1 >= 16:
        m_tile1 //= 2                       # stays a multiple of 8; divides M
    n_tile1 = _pick_tile(n, 4096, 128)
    N1 = _round_up(n, n_tile1)

    grid1 = (M // m_tile1, N1 // n_tile1)
    grid2 = (M // m_tile2, N2 // n_tile2)

    # VMEM limits from per-step footprints (double-buffered IO + temporaries).
    def _vmem_limit(est_bytes):
        return int(min(max(int(est_bytes * 1.5), 16 * 1024 * 1024),
                       int(cap * 0.85)))

    bytes1 = (2 * 4 * (m_tile1 * d_pad + d_pad * n_tile1 + n_tile1
                       + m_tile1 * cand_w)
              + 4 * 4 * m_tile1 * n_tile1          # qx / d2 / select temps
              + 6 * 4 * m_tile1 * cand_w)          # candidate-merge temps
    bytes2 = (2 * 4 * (m_tile2 * d_pad + d_pad * n_tile2 + n_tile2
                       + m_tile2 * cand_w)
              + 3 * 4 * m_tile2 * n_tile2          # qx / d2 / compare temps
              + 2 * 1 * m_tile2 * n_tile2)         # int8 output, double-buffered
    vmem1, vmem2 = _vmem_limit(bytes1), _vmem_limit(bytes2)

    f32 = jnp.float32
    N_max = max(N1, N2)
    q_pad = jnp.zeros((M, d_pad), f32).at[:m, :d].set(queries.astype(f32))
    x_pad = jnp.zeros((N_max, d_pad), f32).at[:n, :d].set(data.astype(f32))
    xt = x_pad.T                                               # [d_pad, N_max]
    xn = jnp.sum(x_pad * x_pad, axis=1)                        # [N_max]
    xn = jnp.where(jnp.arange(N_max) < n, xn, jnp.inf)[None, :]  # pad cols -> +inf
    xt1, xn1 = xt[:, :N1], xn[:, :N1]
    xt2, xn2 = xt[:, :N2], xn[:, :N2]

    # --- Pass 1: kth^2 per query row (candidate buffer as the output) ---
    cands = pl.pallas_call(
        functools.partial(_kth_kernel, n_sel=n_sel, cand_w=cand_w),
        out_shape=jax.ShapeDtypeStruct((M, cand_w), jnp.float32),
        grid_spec=pltpu.PrefetchScalarGridSpec(
            num_scalar_prefetch=0,
            grid=grid1,
            in_specs=[
                pl.BlockSpec((m_tile1, d_pad), lambda i, j: (i, 0)),
                pl.BlockSpec((d_pad, n_tile1), lambda i, j: (0, j)),
                pl.BlockSpec((1, n_tile1), lambda i, j: (0, j)),
            ],
            out_specs=pl.BlockSpec((m_tile1, cand_w), lambda i, j: (i, 0)),
        ),
        compiler_params=pltpu.CompilerParams(
            dimension_semantics=("parallel", "arbitrary"),
            vmem_limit_bytes=vmem1),
    )(q_pad, xt1, xn1)

    # --- Pass 2: int8 membership mask ---
    mask = pl.pallas_call(
        functools.partial(_mask_kernel, n_neighbor=n_neighbor),
        out_shape=jax.ShapeDtypeStruct((M, N2), jnp.int8),
        grid_spec=pltpu.PrefetchScalarGridSpec(
            num_scalar_prefetch=0,
            grid=grid2,
            in_specs=[
                pl.BlockSpec((m_tile2, d_pad), lambda i, j: (i, 0)),
                pl.BlockSpec((d_pad, n_tile2), lambda i, j: (0, j)),
                pl.BlockSpec((1, n_tile2), lambda i, j: (0, j)),
                pl.BlockSpec((m_tile2, cand_w), lambda i, j: (i, 0)),
            ],
            out_specs=pl.BlockSpec((m_tile2, n_tile2), lambda i, j: (i, j)),
        ),
        compiler_params=pltpu.CompilerParams(
            dimension_semantics=("parallel", "parallel"),
            vmem_limit_bytes=vmem2),
    )(q_pad, xt2, xn2, cands)

    # Row counts + row splits reduced on device.
    mask_m = mask[:m]
    counts = jnp.sum(mask_m.astype(jnp.int32), axis=1)                 # [m]
    splits_dev = jnp.concatenate(
        [jnp.zeros((1,), jnp.int32), jnp.cumsum(counts)])              # [m + 1]

    # Bit-pack the membership mask (8 columns per byte, LSB-first) on device
    # so the D2H transfer is 8x smaller.
    bit_w = jnp.asarray([1, 2, 4, 8, 16, 32, 64, 128], dtype=jnp.int32)
    packed = jnp.sum(mask_m.astype(jnp.int32).reshape(m, N2 // 8, 8) * bit_w,
                     axis=-1).astype(jnp.uint8)                        # [m, N2/8]
    packed = jax.block_until_ready(packed)

    # TODO(synk): torch.nonzero has a data-dependent output shape -> host-side.
    in_nbr = np.unpackbits(np.asarray(packed), axis=-1, bitorder="little")[:, :n]
    _, cols = np.nonzero(in_nbr)                # row-major, same order as torch
    nbr_indices = cols.reshape(-1).astype(np.int64)
    splits = np.asarray(splits_dev).astype(np.int64)

    # Returned as NumPy int64 (torch.long equivalent) rather than flipping the
    # global jax_enable_x64 flag for the whole program.
    return {
        "neighbors_index": nbr_indices,
        "neighbors_row_splits": splits,
    }


def _numpy_reference(data, queries, n_neighbor):
    """Pure-numpy transcription of simple_neighbor_search for validation."""
    d = np.asarray(data, dtype=np.float64)
    q = np.asarray(queries, dtype=np.float64)
    dists = np.sqrt(((q[:, None, :] - d[None, :, :]) ** 2).sum(-1))
    k = np.sort(dists, axis=1)[:, n_neighbor]
    in_nbr = np.where(dists - k[:, None] < 0, 1.0, 0.0)
    idx = np.nonzero(in_nbr)[1].reshape(-1).astype(np.int64)
    splits = np.concatenate(([0.0], np.cumsum(in_nbr.sum(axis=1)))).astype(np.int64)
    return idx, splits


if __name__ == "__main__":
    key = jax.random.PRNGKey(0)
    kd, kq = jax.random.split(key)
    n_data, m_queries, dim = 16, 8, 3
    n_neighbor = 3

    data = jax.random.normal(kd, (n_data, dim), dtype=jnp.float32)
    queries = jax.random.normal(kq, (m_queries, dim), dtype=jnp.float32)

    out = fixed_neighbor_search(data, queries, n_neighbor)
    jax.block_until_ready(out["neighbors_row_splits"] if hasattr(
        out["neighbors_row_splits"], "block_until_ready") else jnp.zeros(()))

    ref_idx, ref_splits = _numpy_reference(np.asarray(data), np.asarray(queries), n_neighbor)
    assert out["neighbors_index"].dtype == np.int64
    assert out["neighbors_row_splits"].dtype == np.int64
    assert out["neighbors_row_splits"].shape == (m_queries + 1,)
    np.testing.assert_array_equal(np.asarray(out["neighbors_index"]), ref_idx)
    np.testing.assert_array_equal(np.asarray(out["neighbors_row_splits"]), ref_splits)

    print("KERNEL_OK")
</pallas_src>

<mosaic_0001>
module attributes {stable_mosaic.version = 11 : i64} {
  func.func @_kth_kernel(%arg0: i32, %arg1: i32, %arg2: memref<16x8xf32, #tpu.memory_space<vmem>>, %arg3: memref<8x128xf32, #tpu.memory_space<vmem>>, %arg4: memref<1x128xf32, #tpu.memory_space<vmem>>, %arg5: memref<16x128xf32, #tpu.memory_space<vmem>>) attributes {dimension_semantics = [#tpu.dimension_semantics<parallel>, #tpu.dimension_semantics<arbitrary>], iteration_bounds = array<i64: 2, 1>, scalar_prefetch = 0 : i64, scratch_operands = 0 : i64, tpu.core_type = #tpu.core_type<tc>, window_params = [{transform_indices = @transform_0, window_bounds = array<i64: 16, 8>}, {transform_indices = @transform_1, window_bounds = array<i64: 8, 128>}, {transform_indices = @transform_2, window_bounds = array<i64: 1, 128>}, {transform_indices = @transform_3, window_bounds = array<i64: 16, 128>}]} {
    %c0_i32 = arith.constant 0 : i32
    %0 = arith.cmpi eq, %arg1, %c0_i32 : i32
    %1 = arith.extui %0 : i1 to i32
    %c0_i32_0 = arith.constant 0 : i32
    %2 = arith.cmpi ne, %1, %c0_i32_0 : i32
    scf.if %2 {
      %cst_34 = arith.constant 0x7F800000 : f32
      %177 = vector.broadcast %cst_34 : f32 to vector<16x128xf32>
      %c0_35 = arith.constant 0 : index
      %c0_36 = arith.constant 0 : index
      %178 = vector.load %arg5[%c0_35, %c0_36] : memref<16x128xf32, #tpu.memory_space<vmem>>, vector<16x128xf32>
      tpu.vector_store %arg5[%c0_35, %c0_36], %177 {strides = array<i32>} : memref<16x128xf32, #tpu.memory_space<vmem>>, vector<16x128xf32>,
    } else {
    }
    %c0 = arith.constant 0 : index
    %c0_1 = arith.constant 0 : index
    %3 = vector.load %arg2[%c0, %c0_1] : memref<16x8xf32, #tpu.memory_space<vmem>>, vector<16x8xf32>
    %4 = arith.mulf %3, %3 : vector<16x8xf32>
    %cst = arith.constant dense<0.000000e+00> : vector<16xf32>
    %5 = vector.multi_reduction <add>, %4, %cst [1] : vector<16x8xf32> to vector<16xf32>
    %6 = vector.shape_cast %5 : vector<16xf32> to vector<16x1xf32>
    %c0_2 = arith.constant 0 : index
    %c0_3 = arith.constant 0 : index
    %7 = vector.load %arg3[%c0_2, %c0_3] : memref<8x128xf32, #tpu.memory_space<vmem>>, vector<8x128xf32>
    %cst_4 = arith.constant dense<0.000000e+00> : vector<16x128xf32>
    %8 = tpu.matmul %3, %7, %cst_4 {dimension_numbers = #tpu.dot_dimension_numbers<[1], [0], [0], [1], [0, 0, 1, 1], [], []>} : vector<16x8xf32>, vector<8x128xf32>, vector<16x128xf32> -> vector<16x128xf32>
    %c0_5 = arith.constant 0 : index
    %c0_6 = arith.constant 0 : index
    %9 = vector.load %arg4[%c0_5, %c0_6] : memref<1x128xf32, #tpu.memory_space<vmem>>, vector<1x128xf32>
    %10 = vector.broadcast %6 : vector<16x1xf32> to vector<16x128xf32>
    %11 = vector.broadcast %9 : vector<1x128xf32> to vector<16x128xf32>
    %12 = arith.addf %10, %11 : vector<16x128xf32>
    %cst_7 = arith.constant 2.000000e+00 : f32
    %13 = vector.broadcast %cst_7 : f32 to vector<16x128xf32>
    %14 = arith.mulf %13, %8 : vector<16x128xf32>
    %15 = arith.subf %12, %14 : vector<16x128xf32>
    %cst_8 = arith.constant 0.000000e+00 : f32
    %16 = vector.broadcast %cst_8 : f32 to vector<16x128xf32>
    %17 = arith.maximumf %15, %16 : vector<16x128xf32>
    %18 = tpu.iota {dimensions = array<i32: 1>} : vector<1x128xi32>
    %19 = arith.sitofp %18 : vector<1x128xi32> to vector<1x128xf32>
    %c0_9 = arith.constant 0 : index
    %c0_10 = arith.constant 0 : index
    %20 = vector.load %arg5[%c0_9, %c0_10] : memref<16x128xf32, #tpu.memory_space<vmem>>, vector<16x128xf32>
    %cst_11 = arith.constant 0x7F800000 : f32
    %21 = vector.broadcast %cst_11 : f32 to vector<16x128xf32>
    %cst_12 = arith.constant 0.000000e+00 : f32
    %22 = vector.broadcast %cst_12 : f32 to vector<16x1xf32>
    %cst_13 = arith.constant -1.000000e+00 : f32
    %23 = vector.broadcast %cst_13 : f32 to vector<16x1xf32>
    %cst_14 = arith.constant 0x7F800000 : f32
    %c0_i32_15 = arith.constant 0 : i32
    %24 = vector.broadcast %23 : vector<16x1xf32> to vector<16x128xf32>
    %25 = arith.cmpf ogt, %17, %24 : vector<16x128xf32>
    %26 = vector.broadcast %cst_14 : f32 to vector<16x128xf32>
    %27 = arith.select %25, %17, %26 : vector<16x128xi1>, vector<16x128xf32>
    %cst_16 = arith.constant dense<0x7F800000> : vector<16xf32>
    %28 = vector.multi_reduction <minimumf>, %27, %cst_16 [1] : vector<16x128xf32> to vector<16xf32>
    %29 = vector.shape_cast %28 : vector<16xf32> to vector<16x1xf32>
    %30 = vector.broadcast %23 : vector<16x1xf32> to vector<16x128xf32>
    %31 = arith.cmpf ogt, %20, %30 : vector<16x128xf32>
    %32 = vector.broadcast %cst_14 : f32 to vector<16x128xf32>
    %33 = arith.select %31, %20, %32 : vector<16x128xi1>, vector<16x128xf32>
    %cst_17 = arith.constant dense<0x7F800000> : vector<16xf32>
    %34 = vector.multi_reduction <minimumf>, %33, %cst_17 [1] : vector<16x128xf32> to vector<16xf32>
    %35 = vector.shape_cast %34 : vector<16xf32> to vector<16x1xf32>
    %36 = arith.minimumf %29, %35 : vector<16x1xf32>
    %37 = vector.broadcast %36 : vector<16x1xf32> to vector<16x128xf32>
    %38 = arith.cmpf oeq, %17, %37 : vector<16x128xf32>
    %39 = arith.extui %38 : vector<16x128xi1> to vector<16x128xi32>
    %40 = arith.sitofp %39 : vector<16x128xi32> to vector<16x128xf32>
    %cst_18 = arith.constant dense<0.000000e+00> : vector<16xf32>
    %41 = vector.multi_reduction <add>, %40, %cst_18 [1] : vector<16x128xf32> to vector<16xf32>
    %42 = vector.shape_cast %41 : vector<16xf32> to vector<16x1xf32>
    %43 = vector.broadcast %36 : vector<16x1xf32> to vector<16x128xf32>
    %44 = arith.cmpf oeq, %20, %43 : vector<16x128xf32>
    %45 = arith.extui %44 : vector<16x128xi1> to vector<16x128xi32>
    %46 = arith.sitofp %45 : vector<16x128xi32> to vector<16x128xf32>
    %cst_19 = arith.constant dense<0.000000e+00> : vector<16xf32>
    %47 = vector.multi_reduction <add>, %46, %cst_19 [1] : vector<16x128xf32> to vector<16xf32>
    %48 = vector.shape_cast %47 : vector<16xf32> to vector<16x1xf32>
    %49 = arith.addf %42, %48 : vector<16x1xf32>
    %50 = vector.broadcast %19 : vector<1x128xf32> to vector<16x128xf32>
    %51 = vector.broadcast %22 : vector<16x1xf32> to vector<16x128xf32>
    %52 = arith.cmpf oge, %50, %51 : vector<16x128xf32>
    %53 = arith.addf %22, %49 : vector<16x1xf32>
    %54 = vector.broadcast %19 : vector<1x128xf32> to vector<16x128xf32>
    %55 = vector.broadcast %53 : vector<16x1xf32> to vector<16x128xf32>
    %56 = arith.cmpf olt, %54, %55 : vector<16x128xf32>
    %57 = arith.andi %52, %56 : vector<16x128xi1>
    %58 = vector.shape_cast %36 : vector<16x1xf32> to vector<16x1xf32>
    %59 = vector.broadcast %58 : vector<16x1xf32> to vector<16x128xf32>
    %60 = arith.select %57, %59, %21 : vector<16x128xi1>, vector<16x128xf32>
    %61 = arith.addf %22, %49 : vector<16x1xf32>
    %c1_i32 = arith.constant 1 : i32
    %62 = vector.broadcast %36 : vector<16x1xf32> to vector<16x128xf32>
    %63 = arith.cmpf ogt, %17, %62 : vector<16x128xf32>
    %64 = vector.broadcast %cst_14 : f32 to vector<16x128xf32>
    %65 = arith.select %63, %17, %64 : vector<16x128xi1>, vector<16x128xf32>
    %cst_20 = arith.constant dense<0x7F800000> : vector<16xf32>
    %66 = vector.multi_reduction <minimumf>, %65, %cst_20 [1] : vector<16x128xf32> to vector<16xf32>
    %67 = vector.shape_cast %66 : vector<16xf32> to vector<16x1xf32>
    %68 = vector.broadcast %36 : vector<16x1xf32> to vector<16x128xf32>
    %69 = arith.cmpf ogt, %20, %68 : vector<16x128xf32>
    %70 = vector.broadcast %cst_14 : f32 to vector<16x128xf32>
    %71 = arith.select %69, %20, %70 : vector<16x128xi1>, vector<16x128xf32>
    %cst_21 = arith.constant dense<0x7F800000> : vector<16xf32>
    %72 = vector.multi_reduction <minimumf>, %71, %cst_21 [1] : vector<16x128xf32> to vector<16xf32>
    %73 = vector.shape_cast %72 : vector<16xf32> to vector<16x1xf32>
    %74 = arith.minimumf %67, %73 : vector<16x1xf32>
    %75 = vector.broadcast %74 : vector<16x1xf32> to vector<16x128xf32>
    %76 = arith.cmpf oeq, %17, %75 : vector<16x128xf32>
    %77 = arith.extui %76 : vector<16x128xi1> to vector<16x128xi32>
    %78 = arith.sitofp %77 : vector<16x128xi32> to vector<16x128xf32>
    %cst_22 = arith.constant dense<0.000000e+00> : vector<16xf32>
    %79 = vector.multi_reduction <add>, %78, %cst_22 [1] : vector<16x128xf32> to vector<16xf32>
    %80 = vector.shape_cast %79 : vector<16xf32> to vector<16x1xf32>
    %81 = vector.broadcast %74 : vector<16x1xf32> to vector<16x128xf32>
    %82 = arith.cmpf oeq, %20, %81 : vector<16x128xf32>
    %83 = arith.extui %82 : vector<16x128xi1> to vector<16x128xi32>
    %84 = arith.sitofp %83 : vector<16x128xi32> to vector<16x128xf32>
    %cst_23 = arith.constant dense<0.000000e+00> : vector<16xf32>
    %85 = vector.multi_reduction <add>, %84, %cst_23 [1] : vector<16x128xf32> to vector<16xf32>
    %86 = vector.shape_cast %85 : vector<16xf32> to vector<16x1xf32>
    %87 = arith.addf %80, %86 : vector<16x1xf32>
    %88 = vector.broadcast %19 : vector<1x128xf32> to vector<16x128xf32>
    %89 = vector.broadcast %61 : vector<16x1xf32> to vector<16x128xf32>
    %90 = arith.cmpf oge, %88, %89 : vector<16x128xf32>
    %91 = arith.addf %61, %87 : vector<16x1xf32>
    %92 = vector.broadcast %19 : vector<1x128xf32> to vector<16x128xf32>
    %93 = vector.broadcast %91 : vector<16x1xf32> to vector<16x128xf32>
    %94 = arith.cmpf olt, %92, %93 : vector<16x128xf32>
    %95 = arith.andi %90, %94 : vector<16x128xi1>
    %96 = vector.shape_cast %74 : vector<16x1xf32> to vector<16x1xf32>
    %97 = vector.broadcast %96 : vector<16x1xf32> to vector<16x128xf32>
    %98 = arith.select %95, %97, %60 : vector<16x128xi1>, vector<16x128xf32>
    %99 = arith.addf %61, %87 : vector<16x1xf32>
    %c2_i32 = arith.constant 2 : i32
    %100 = vector.broadcast %74 : vector<16x1xf32> to vector<16x128xf32>
    %101 = arith.cmpf ogt, %17, %100 : vector<16x128xf32>
    %102 = vector.broadcast %cst_14 : f32 to vector<16x128xf32>
    %103 = arith.select %101, %17, %102 : vector<16x128xi1>, vector<16x128xf32>
    %cst_24 = arith.constant dense<0x7F800000> : vector<16xf32>
    %104 = vector.multi_reduction <minimumf>, %103, %cst_24 [1] : vector<16x128xf32> to vector<16xf32>
    %105 = vector.shape_cast %104 : vector<16xf32> to vector<16x1xf32>
    %106 = vector.broadcast %74 : vector<16x1xf32> to vector<16x128xf32>
    %107 = arith.cmpf ogt, %20, %106 : vector<16x128xf32>
    %108 = vector.broadcast %cst_14 : f32 to vector<16x128xf32>
    %109 = arith.select %107, %20, %108 : vector<16x128xi1>, vector<16x128xf32>
    %cst_25 = arith.constant dense<0x7F800000> : vector<16xf32>
    %110 = vector.multi_reduction <minimumf>, %109, %cst_25 [1] : vector<16x128xf32> to vector<16xf32>
    %111 = vector.shape_cast %110 : vector<16xf32> to vector<16x1xf32>
    %112 = arith.minimumf %105, %111 : vector<16x1xf32>
    %113 = vector.broadcast %112 : vector<16x1xf32> to vector<16x128xf32>
    %114 = arith.cmpf oeq, %17, %113 : vector<16x128xf32>
    %115 = arith.extui %114 : vector<16x128xi1> to vector<16x128xi32>
    %116 = arith.sitofp %115 : vector<16x128xi32> to vector<16x128xf32>
    %cst_26 = arith.constant dense<0.000000e+00> : vector<16xf32>
    %117 = vector.multi_reduction <add>, %116, %cst_26 [1] : vector<16x128xf32> to vector<16xf32>
    %118 = vector.shape_cast %117 : vector<16xf32> to vector<16x1xf32>
    %119 = vector.broadcast %112 : vector<16x1xf32> to vector<16x128xf32>
    %120 = arith.cmpf oeq, %20, %119 : vector<16x128xf32>
    %121 = arith.extui %120 : vector<16x128xi1> to vector<16x128xi32>
    %122 = arith.sitofp %121 : vector<16x128xi32> to vector<16x128xf32>
    %cst_27 = arith.constant dense<0.000000e+00> : vector<16xf32>
    %123 = vector.multi_reduction <add>, %122, %cst_27 [1] : vector<16x128xf32> to vector<16xf32>
    %124 = vector.shape_cast %123 : vector<16xf32> to vector<16x1xf32>
    %125 = arith.addf %118, %124 : vector<16x1xf32>
    %126 = vector.broadcast %19 : vector<1x128xf32> to vector<16x128xf32>
    %127 = vector.broadcast %99 : vector<16x1xf32> to vector<16x128xf32>
    %128 = arith.cmpf oge, %126, %127 : vector<16x128xf32>
    %129 = arith.addf %99, %125 : vector<16x1xf32>
    %130 = vector.broadcast %19 : vector<1x128xf32> to vector<16x128xf32>
    %131 = vector.broadcast %129 : vector<16x1xf32> to vector<16x128xf32>
    %132 = arith.cmpf olt, %130, %131 : vector<16x128xf32>
    %133 = arith.andi %128, %132 : vector<16x128xi1>
    %134 = vector.shape_cast %112 : vector<16x1xf32> to vector<16x1xf32>
    %135 = vector.broadcast %134 : vector<16x1xf32> to vector<16x128xf32>
    %136 = arith.select %133, %135, %98 : vector<16x128xi1>, vector<16x128xf32>
    %137 = arith.addf %99, %125 : vector<16x1xf32>
    %c3_i32 = arith.constant 3 : i32
    %138 = vector.broadcast %112 : vector<16x1xf32> to vector<16x128xf32>
    %139 = arith.cmpf ogt, %17, %138 : vector<16x128xf32>
    %140 = vector.broadcast %cst_14 : f32 to vector<16x128xf32>
    %141 = arith.select %139, %17, %140 : vector<16x128xi1>, vector<16x128xf32>
    %cst_28 = arith.constant dense<0x7F800000> : vector<16xf32>
    %142 = vector.multi_reduction <minimumf>, %141, %cst_28 [1] : vector<16x128xf32> to vector<16xf32>
    %143 = vector.shape_cast %142 : vector<16xf32> to vector<16x1xf32>
    %144 = vector.broadcast %112 : vector<16x1xf32> to vector<16x128xf32>
    %145 = arith.cmpf ogt, %20, %144 : vector<16x128xf32>
    %146 = vector.broadcast %cst_14 : f32 to vector<16x128xf32>
    %147 = arith.select %145, %20, %146 : vector<16x128xi1>, vector<16x128xf32>
    %cst_29 = arith.constant dense<0x7F800000> : vector<16xf32>
    %148 = vector.multi_reduction <minimumf>, %147, %cst_29 [1] : vector<16x128xf32> to vector<16xf32>
    %149 = vector.shape_cast %148 : vector<16xf32> to vector<16x1xf32>
    %150 = arith.minimumf %143, %149 : vector<16x1xf32>
    %151 = vector.broadcast %150 : vector<16x1xf32> to vector<16x128xf32>
    %152 = arith.cmpf oeq, %17, %151 : vector<16x128xf32>
    %153 = arith.extui %152 : vector<16x128xi1> to vector<16x128xi32>
    %154 = arith.sitofp %153 : vector<16x128xi32> to vector<16x128xf32>
    %cst_30 = arith.constant dense<0.000000e+00> : vector<16xf32>
    %155 = vector.multi_reduction <add>, %154, %cst_30 [1] : vector<16x128xf32> to vector<16xf32>
    %156 = vector.shape_cast %155 : vector<16xf32> to vector<16x1xf32>
    %157 = vector.broadcast %150 : vector<16x1xf32> to vector<16x128xf32>
    %158 = arith.cmpf oeq, %20, %157 : vector<16x128xf32>
    %159 = arith.extui %158 : vector<16x128xi1> to vector<16x128xi32>
    %160 = arith.sitofp %159 : vector<16x128xi32> to vector<16x128xf32>
    %cst_31 = arith.constant dense<0.000000e+00> : vector<16xf32>
    %161 = vector.multi_reduction <add>, %160, %cst_31 [1] : vector<16x128xf32> to vector<16xf32>
    %162 = vector.shape_cast %161 : vector<16xf32> to vector<16x1xf32>
    %163 = arith.addf %156, %162 : vector<16x1xf32>
    %164 = vector.broadcast %19 : vector<1x128xf32> to vector<16x128xf32>
    %165 = vector.broadcast %137 : vector<16x1xf32> to vector<16x128xf32>
    %166 = arith.cmpf oge, %164, %165 : vector<16x128xf32>
    %167 = arith.addf %137, %163 : vector<16x1xf32>
    %168 = vector.broadcast %19 : vector<1x128xf32> to vector<16x128xf32>
    %169 = vector.broadcast %167 : vector<16x1xf32> to vector<16x128xf32>
    %170 = arith.cmpf olt, %168, %169 : vector<16x128xf32>
    %171 = arith.andi %166, %170 : vector<16x128xi1>
    %172 = vector.shape_cast %150 : vector<16x1xf32> to vector<16x1xf32>
    %173 = vector.broadcast %172 : vector<16x1xf32> to vector<16x128xf32>
    %174 = arith.select %171, %173, %136 : vector<16x128xi1>, vector<16x128xf32>
    %175 = arith.addf %137, %163 : vector<16x1xf32>
    %c0_32 = arith.constant 0 : index
    %c0_33 = arith.constant 0 : index
    %176 = vector.load %arg5[%c0_32, %c0_33] : memref<16x128xf32, #tpu.memory_space<vmem>>, vector<16x128xf32>
    tpu.vector_store %arg5[%c0_32, %c0_33], %174 {strides = array<i32>} : memref<16x128xf32, #tpu.memory_space<vmem>>, vector<16x128xf32>,
    return
  }
  func.func @transform_0(%arg0: i32, %arg1: i32) -> (i32, i32) {
    %c0_i32 = arith.constant 0 : i32
    %c0_i32_0 = arith.constant 0 : i32
    return %arg0, %c0_i32 : i32, i32
  }
  func.func @transform_1(%arg0: i32, %arg1: i32) -> (i32, i32) {
    %c0_i32 = arith.constant 0 : i32
    %c0_i32_0 = arith.constant 0 : i32
    return %c0_i32, %arg1 : i32, i32
  }
  func.func @transform_2(%arg0: i32, %arg1: i32) -> (i32, i32) {
    %c0_i32 = arith.constant 0 : i32
    %c0_i32_0 = arith.constant 0 : i32
    return %c0_i32, %arg1 : i32, i32
  }
  func.func @transform_3(%arg0: i32, %arg1: i32) -> (i32, i32) {
    %c0_i32 = arith.constant 0 : i32
    %c0_i32_0 = arith.constant 0 : i32
    return %arg0, %c0_i32 : i32, i32
  }
}

</mosaic_0001>

<bundles_post_ra>
// kernel: tpu_custom_call.1
= control target key start
LH: loop header
LB: loop body
LE: loop exit
PB: predicated region body
PF: predicated region fallthrough
CT: control target
= control target key end

     0   :  { %8 = vsyncpa [#allocation3], 0  ;;  %s1090_s0 = inlined_call_operand.vmem [shape: f32[32,8], index: 0, kind: input, shape index: {}]   ;;  %s1091_s1 = inlined_call_operand.vmem [shape: f32[8,128], index: 1, kind: input, shape index: {}]   ;;  %s1092_s2 = inlined_call_operand.vmem [shape: f32[1,128], index: 2, kind: input, shape index: {}]   ;;  %s1093_s3 = inlined_call_operand.hbm [shape: f32[32,128], index: 3, kind: output, shape index: {}]  }
   0x1   :  { %10 = vsyncpa [#allocation3 + $0x1], 0  ;;  %s865_s12 = smov 0   ;;  %s867_s13 = smov 0  }
   0x2   :  { %s869_s14 = smov 0   ;;  %s871_s15 = smov 0  }
   0x3   :  { %s873_s16 = smov 0   ;;  %s875_s17 = smov 0  }
   0x4 LB: > { %s646_s18 = sadd.s32 4294967295, %s838_s17   ;;  %s647_s19 = sadd.s32 4294967294, %s838_s17   ;;  %s838_s17 = sphi %s875_s17, %s16_s17   ;;  %s834_s16 = sphi %s873_s16, %s1106_s16   ;;  %s830_s15 = sphi %s871_s15, %s1105_s15   ;;  %s826_s14 = sphi %s869_s14, %s1104_s14   ;;  %s822_s13 = sphi %s867_s13, %s1103_s13   ;;  %s818_s12 = sphi %s865_s12, %s1102_s12  }
   0x5   : > { %s28_s20 = sadd.s32 1, %s834_s16  ;;  %s113_s21 = sadd.s32 1, %s826_s14 }
   0x6   : > { %p30_p0 = scmp.ge.s32.totalorder %s28_s20, 2  ;;  %p123_p1 = scmp.ne.s32.totalorder %s826_s14, %s822_s13 }
   0x7   : > { %p124_p2 = scmp.eq.s32.totalorder %s646_s18, 1  ;;  %p129_p3 = scmp.ne.s32.totalorder %s822_s13, %s818_s12 }
   0x8   : > { %s1108_s20 = smov (%p30_p0, %s28_s20), 0  ;;  %p130_p5 = scmp.eq.s32.totalorder %s647_s19, 1 }
   0x9   : > { %p905_p4 = por %p124_p2, %p123_p1  ;;  %s110_s23 = ssub.s32 %s834_s16, %s1108_s20 }
   0xa   : > { %p652_p6 = scmp.ge.s32.totalorder %s838_s17, 1  ;;  %p111_p7 = scmp.eq.s32.totalorder %s110_s23, 0 }
   0xb   : > { %p912_p8 = por %p130_p5, %p129_p3  ;;  %p170_p9 = scmp.lt.s32.totalorder %s838_s17, 3 }
   0xc   : > { %s918_s25 = scalar_select %p111_p7, %s826_s14, %s113_s21  }
   0xd   : > { %p171_p10 = pnand %p652_p6, %p170_p9 }
   0xe   : > { %s654_s28 = sshll.u32 (!%p171_p10), %s830_s15, 1  ;;  %s198_s8 = sand.u32 (!%p171_p10), 1, %s822_s13  }
   0xf   : > { %174 = sbr.rel (%p171_p10) target bundleno = 977 (0x3d1), region = 32  ;;  %p202_p11 = scmp.lt.s32.totalorder (!%p171_p10), %s654_s28, 3 }
  0x10   : > { %s653_s9 = sshll.u32 (!%p171_p10), %s198_s8, 4  ;;  %s680_s10 = sshll.u32 (!%p171_p10), %s830_s15, 8 }
  0x11   : > { %s200_s11 = scalar_lea.vmem (!%p171_p10), [#allocation2], %s653_s9  ;;  %s1037_s15 = scalar_lea.hbm (!%p171_p10), %s1093_s3, %s680_s10 }
  0x12   : > { %s549_s18 = sshll.u32 (!%p171_p10), %s200_s11, 4  ;;  %s1045_s23 = scalar_lea.sflag (!%p171_p10), [#allocation3], %s198_s8  ;;  %s1039_s18 = int_to_ptr.vmem [resolvable:$true] %s549_s18 }
  0x13   : > { %s762_s26 = scalar_lea.vmem (!%p171_p10), %s1039_s18, 256  ;;  %s842_s27 = smov (!%p171_p10), [#allocation2]  }
  0x14   : > { %v232_v0 = vld [vmem:[%s1091_s1] sm:$0xff]  ;;  %s1110_s28 = smov (!%p202_p11, %s654_s28), 3  ;;  %vm225_vm0 = vcmask 64512   ;;  %v840_v7 = vmov inf   ;;  %v841_v47 = vmov 0.0   ;;  %p763_p12 = scmp.ne.s32.totalorder %s1039_s18, %s762_s26 }
  0x15   : > { %684 = vmatprep.subr.mxu0 %v232_v0  ;;  %s655_s29 = sshll.u32 %s1110_s28, 3  ;;  %v658_v10 = vld [vmem:[%s1092_s2] ss:$0 sm:$0xff]  ;;  %s766_s28 = sshll.u32 %s842_s27, 4  ;;  %s767_s28 = int_to_ptr.vmem [resolvable:$false] %s766_s28 }
  0x16   : > { %685 = vmatpush3.msra.mxu0 %v232_v0  ;;  %s205_s5 = scalar_lea.vmem %s1090_s0, %s655_s29  ;;  %p764_p13 = pnand %p763_p12, %p905_p4 }
  0x17   : > { %v221_v1 = vld [vmem:[%s205_s5] sm:$0xff]  ;;  %v222_v2 = vld [vmem:[%s205_s5 + $0x8] sm:$0xff]  ;;  %s768_s29 = scalar_lea.vmem %s767_s28, 512  ;;  %p769_p1 = scmp.lt.s32.totalorder %s1039_s18, %s767_s28 }
  0x18   : > { %v223_v3 = vmul.f32 %v221_v1, %v221_v1  ;;  %686 = vmatprep.mubr.msk.f32.mxu0 %vm225_vm0, %v221_v1  ;;  %v224_v4 = vmul.f32 %v222_v2, %v222_v2  ;;  %p765_p0 = pneg %p764_p13  ;;  %p770_p2 = scmp.lt.s32.totalorder %s768_s29, %s762_s26 }
  0x19   : > { %687 = vmatmul.mubr.msk.f32.vlgmr.msra.gmra.mxu0 %vm225_vm0, %v222_v2 }
  0x1a   : > { %v226_v5 = vsel %vm225_vm0, %v223_v3, 0.0  ;;  %v229_v6 = vsel %vm225_vm0, %v224_v4, 0.0  ;;  %p771_p3 = por %p770_p2, %p769_p1 }
  0x1b   : > { %227 = vadd.xlane.f32.xlu0 %v226_v5 }
  0x1c   : > { %p772_p5 = pnand %p771_p3, %p765_p0 }
  0x1f   : > { %230 = vadd.xlane.f32.xlu0 %v229_v6 }
  0x23   : > { %346 = vmin.xlane.f32.xlu0 %v840_v7 }
  0xa4   : > { %v228_v8 = vpop.xlane.xlu0 %227 }
  0xa5   : > { %v321_v15 = vadd.f32 %v658_v10, %v228_v8 }
  0xa8   : > { %v231_v9 = vpop.xlane.xlu0 %230 }
  0xa9   : > { %v322_v11 = vadd.f32 %v658_v10, %v231_v9 }
  0xac   : > { %v347_v24 = vpop.xlane.xlu0 %346 }
  0xd9   : > { %v688_v12 = vpop.f32.mrf.mxu0 }
  0xda   : > { %v324_v13 = vmul.f32 2.0, %v688_v12 }
  0xdb   : > { %v305_v14 = vpop.f32.mrf.mxu0 }
  0xdc   : > { %v326_v16 = vsub.f32 %v322_v11, %v324_v13  ;;  %v323_v17 = vmul.f32 2.0, %v305_v14 }
  0xde   : > { %v931_v18 = vmax.f32 %v326_v16, 0.0  ;;  %v325_v19 = vsub.f32 %v321_v15, %v323_v17  ;;  %v329_v15 = vlaneseq }
  0xe0   : > { %v933_v20 = vmax.f32 %v325_v19, 0.0  ;;  %vm335_vm1 = vcmp.gt.f32.partialorder %v931_v18, -1.0 }
  0xe1   : > { %v337_v21 = vsel %vm335_vm1, %v931_v18, inf }
  0xe2   : > { %340 = vmin.xlane.f32.xlu1 %v337_v21  ;;  %vm334_vm2 = vcmp.gt.f32.partialorder %v933_v20, -1.0 }
  0xe3   : > { %v336_v22 = vsel %vm334_vm2, %v933_v20, inf }
  0xe6   : > { %338 = vmin.xlane.f32.xlu1 %v336_v22 }
  0xea   : > { %348 = vmin.xlane.f32.xlu1 %v840_v7 }
 0x16b   : > { %v341_v23 = vpop.xlane.xlu1 %340 }
 0x16f   : > { %v339_v25 = vpop.xlane.xlu1 %338 }
 0x170   : > { %v940_v26 = vmin.f32 %v339_v25, %v347_v24 }
 0x172   : > { %vm383_vm3 = vcmp.gt.f32.partialorder %v933_v20, %v940_v26  ;;  %vm352_vm9 = vcmp.eq.f32.partialorder %v933_v20, %v940_v26  ;;  %vm754_vm11 = vcmp.eq.f32.partialorder %v940_v26, inf }
 0x173   : > { %v349_v27 = vpop.xlane.xlu1 %348  ;;  %v385_v28 = vsel %vm383_vm3, %v933_v20, inf  ;;  %v659_v48 = vsel %vm352_vm9, 1.0, %v841_v47  ;;  %v661_v50 = vsel %vm754_vm11, 1.0, %v841_v47 }
 0x174   : > { %v945_v29 = vmin.f32 %v341_v23, %v349_v27  ;;  %387 = vmin.xlane.f32.xlu0 %v385_v28 }
 0x176   : > { %vm384_vm4 = vcmp.gt.f32.partialorder %v931_v18, %v945_v29  ;;  %vm353_vm10 = vcmp.eq.f32.partialorder %v931_v18, %v945_v29  ;;  %vm755_vm12 = vcmp.eq.f32.partialorder %v945_v29, inf }
 0x177   : > { %v386_v30 = vsel %vm384_vm4, %v931_v18, inf  ;;  %v660_v49 = vsel %vm353_vm10, 1.0, %v841_v47  ;;  %v662_v51 = vsel %vm755_vm12, 1.0, %v841_v47 }
 0x178   : > { %389 = vmin.xlane.f32.xlu1 %v386_v30  ;;  %395 = vmin.xlane.f32.xlu0 %v840_v7 }
 0x17c   : > { %397 = vmin.xlane.f32.xlu1 %v840_v7 }
 0x1fd   : > { %v388_v31 = vpop.xlane.xlu0 %387 }
 0x201   : > { %v390_v32 = vpop.xlane.xlu1 %389  ;;  %v396_v33 = vpop.xlane.xlu0 %395 }
 0x202   : > { %v952_v34 = vmin.f32 %v388_v31, %v396_v33 }
 0x204   : > { %vm433_vm5 = vcmp.gt.f32.partialorder %v933_v20, %v952_v34  ;;  %vm401_vm13 = vcmp.eq.f32.partialorder %v933_v20, %v952_v34  ;;  %vm756_vm15 = vcmp.eq.f32.partialorder %v952_v34, inf }
 0x205   : > { %v398_v35 = vpop.xlane.xlu1 %397  ;;  %v435_v36 = vsel %vm433_vm5, %v933_v20, inf  ;;  %v663_v52 = vsel %vm401_vm13, 1.0, %v841_v47  ;;  %v665_v54 = vsel %vm756_vm15, 1.0, %v841_v47 }
 0x206   : > { %v957_v37 = vmin.f32 %v390_v32, %v398_v35  ;;  %437 = vmin.xlane.f32.xlu0 %v435_v36 }
 0x208   : > { %vm434_vm6 = vcmp.gt.f32.partialorder %v931_v18, %v957_v37  ;;  %vm402_vm14 = vcmp.eq.f32.partialorder %v931_v18, %v957_v37  ;;  %vm757_vm0 = vcmp.eq.f32.partialorder %v957_v37, inf }
 0x209   : > { %v436_v38 = vsel %vm434_vm6, %v931_v18, inf  ;;  %v664_v53 = vsel %vm402_vm14, 1.0, %v841_v47  ;;  %v666_v55 = vsel %vm757_vm0, 1.0, %v841_v47 }
 0x20a   : > { %439 = vmin.xlane.f32.xlu1 %v436_v38  ;;  %445 = vmin.xlane.f32.xlu0 %v840_v7 }
 0x20e   : > { %447 = vmin.xlane.f32.xlu1 %v840_v7 }
 0x28f   : > { %v438_v39 = vpop.xlane.xlu0 %437 }
 0x293   : > { %v440_v40 = vpop.xlane.xlu1 %439  ;;  %v446_v41 = vpop.xlane.xlu0 %445 }
 0x294   : > { %v964_v42 = vmin.f32 %v438_v39, %v446_v41 }
 0x296   : > { %vm483_vm7 = vcmp.gt.f32.partialorder %v933_v20, %v964_v42  ;;  %vm451_vm1 = vcmp.eq.f32.partialorder %v933_v20, %v964_v42  ;;  %vm758_vm3 = vcmp.eq.f32.partialorder %v964_v42, inf }
 0x297   : > { %v448_v43 = vpop.xlane.xlu1 %447  ;;  %v485_v44 = vsel %vm483_vm7, %v933_v20, inf  ;;  %v667_v56 = vsel %vm451_vm1, 1.0, %v841_v47  ;;  %v669_v58 = vsel %vm758_vm3, 1.0, %v841_v47 }
 0x298   : > { %v969_v45 = vmin.f32 %v440_v40, %v448_v43  ;;  %487 = vmin.xlane.f32.xlu0 %v485_v44 }
 0x29a   : > { %vm484_vm8 = vcmp.gt.f32.partialorder %v931_v18, %v969_v45  ;;  %vm452_vm2 = vcmp.eq.f32.partialorder %v931_v18, %v969_v45  ;;  %vm759_vm4 = vcmp.eq.f32.partialorder %v969_v45, inf }
 0x29b   : > { %v486_v46 = vsel %vm484_vm8, %v931_v18, inf  ;;  %v668_v57 = vsel %vm452_vm2, 1.0, %v841_v47  ;;  %v670_v59 = vsel %vm759_vm4, 1.0, %v841_v47 }
 0x29c   : > { %489 = vmin.xlane.f32.xlu1 %v486_v46  ;;  %495 = vmin.xlane.f32.xlu0 %v840_v7 }
 0x2a0   : > { %497 = vmin.xlane.f32.xlu1 %v840_v7  ;;  %358 = vadd.xlane.f32.xlu0 %v659_v48 }
 0x2a4   : > { %360 = vadd.xlane.f32.xlu1 %v660_v49  ;;  %368 = vadd.xlane.f32.xlu0 %v661_v50 }
 0x2a8   : > { %370 = vadd.xlane.f32.xlu1 %v662_v51  ;;  %407 = vadd.xlane.f32.xlu0 %v663_v52 }
 0x2ac   : > { %409 = vadd.xlane.f32.xlu1 %v664_v53  ;;  %417 = vadd.xlane.f32.xlu0 %v665_v54 }
 0x2b0   : > { %419 = vadd.xlane.f32.xlu1 %v666_v55  ;;  %457 = vadd.xlane.f32.xlu0 %v667_v56 }
 0x2b4   : > { %459 = vadd.xlane.f32.xlu1 %v668_v57  ;;  %467 = vadd.xlane.f32.xlu0 %v669_v58 }
 0x2b8   : > { %469 = vadd.xlane.f32.xlu1 %v670_v59 }
 0x321   : > { %v488_v60 = vpop.xlane.xlu0 %487 }
 0x325   : > { %v490_v61 = vpop.xlane.xlu1 %489  ;;  %v496_v62 = vpop.xlane.xlu0 %495 }
 0x326   : > { %v994_v63 = vmin.f32 %v488_v60, %v496_v62 }
 0x328   : > { %vm501_vm5 = vcmp.eq.f32.partialorder %v933_v20, %v994_v63  ;;  %vm760_vm6 = vcmp.eq.f32.partialorder %v994_v63, inf }
 0x329   : > { %v498_v0 = vpop.xlane.xlu1 %497  ;;  %v671_v1 = vsel %vm501_vm5, 1.0, %v841_v47  ;;  %v673_v4 = vsel %vm760_vm6, 1.0, %v841_v47  ;;  %v359_v6 = vpop.xlane.xlu0 %358 }
 0x32a   : > { %v998_v2 = vmin.f32 %v490_v61, %v498_v0  ;;  %507 = vadd.xlane.f32.xlu0 %v671_v1 }
 0x32c   : > { %vm502_vm7 = vcmp.eq.f32.partialorder %v931_v18, %v998_v2  ;;  %vm761_vm8 = vcmp.eq.f32.partialorder %v998_v2, inf  ;;  %v330_v18 = vand.u32 127, %v329_v15 }
 0x32d   : > { %v672_v3 = vsel %vm502_vm7, 1.0, %v841_v47  ;;  %v674_v5 = vsel %vm761_vm8, 1.0, %v841_v47  ;;  %v361_v7 = vpop.xlane.xlu1 %360  ;;  %v369_v8 = vpop.xlane.xlu0 %368 }
 0x32e   : > { %509 = vadd.xlane.f32.xlu1 %v672_v3  ;;  %517 = vadd.xlane.f32.xlu0 %v673_v4  ;;  %v372_v20 = vadd.f32 %v369_v8, %v359_v6  ;;  %v331_v23 = vcvt.s32.f32 %v330_v18 }
 0x330   : > { %vm374_vm9 = vcmp.ge.f32.partialorder %v331_v23, 0.0  ;;  %vm377_vm10 = vcmp.lt.f32.partialorder %v331_v23, %v372_v20  ;;  %vm423_vm14 = vcmp.ge.f32.partialorder %v331_v23, %v372_v20 }
 0x331   : > { %v371_v9 = vpop.xlane.xlu1 %370  ;;  %v408_v10 = vpop.xlane.xlu0 %407  ;;  %vm1006_vm13 = vmand %vm374_vm9, %vm377_vm10 }
 0x332   : > { %519 = vadd.xlane.f32.xlu1 %v674_v5  ;;  %v373_v27 = vadd.f32 %v371_v9, %v361_v7  ;;  %v381_v43 = vsel %vm1006_vm13, %v940_v26, inf }
 0x334   : > { %vm378_vm15 = vcmp.lt.f32.partialorder %v331_v23, %v373_v27  ;;  %vm424_vm5 = vcmp.ge.f32.partialorder %v331_v23, %v373_v27 }
 0x335   : > { %v410_v11 = vpop.xlane.xlu1 %409  ;;  %v418_v12 = vpop.xlane.xlu0 %417  ;;  %vm1020_vm4 = vmand %vm374_vm9, %vm378_vm15 }
 0x336   : > { %v421_v19 = vadd.f32 %v418_v12, %v408_v10 }
 0x338   : > { %v425_v24 = vadd.f32 %v421_v19, %v372_v20 }
 0x339   : > { %v420_v13 = vpop.xlane.xlu1 %419  ;;  %v458_v14 = vpop.xlane.xlu0 %457 }
 0x33a   : > { %v422_v25 = vadd.f32 %v420_v13, %v410_v11  ;;  %vm427_vm11 = vcmp.lt.f32.partialorder %v331_v23, %v425_v24  ;;  %vm473_vm1 = vcmp.ge.f32.partialorder %v331_v23, %v425_v24 }
 0x33b   : > { %vm429_vm0 = vmand %vm423_vm14, %vm427_vm11 }
 0x33c   : > { %v426_v32 = vadd.f32 %v422_v25, %v373_v27  ;;  %v431_v47 = vsel %vm429_vm0, %v952_v34, %v381_v43  ;;  %v382_v34 = vsel %vm1020_vm4, %v945_v29, inf }
 0x33d   : > { %v460_v16 = vpop.xlane.xlu1 %459  ;;  %v468_v17 = vpop.xlane.xlu0 %467 }
 0x33e   : > { %v471_v21 = vadd.f32 %v468_v17, %v458_v14  ;;  %vm428_vm2 = vcmp.lt.f32.partialorder %v331_v23, %v426_v32  ;;  %vm474_vm11 = vcmp.ge.f32.partialorder %v331_v23, %v426_v32 }
 0x33f   : > { %vm430_vm7 = vmand %vm424_vm5, %vm428_vm2 }
 0x340   : > { %v475_v28 = vadd.f32 %v471_v21, %v425_v24  ;;  %v432_v51 = vsel %vm430_vm7, %v957_v37, %v382_v34 }
 0x341   : > { %v470_v22 = vpop.xlane.xlu1 %469 }
 0x342   : > { %v472_v30 = vadd.f32 %v470_v22, %v460_v16  ;;  %vm477_vm12 = vcmp.lt.f32.partialorder %v331_v23, %v475_v28  ;;  %vm523_vm8 = vcmp.ge.f32.partialorder %v331_v23, %v475_v28 }
 0x343   : > { %vm1012_vm3 = vmand %vm473_vm1, %vm477_vm12 }
 0x344   : > { %v476_v33 = vadd.f32 %v472_v30, %v426_v32  ;;  %v481_v49 = vsel %vm1012_vm3, %v964_v42, %v431_v47 }
 0x346   : > { %vm478_vm6 = vcmp.lt.f32.partialorder %v331_v23, %v476_v33  ;;  %vm524_vm13 = vcmp.ge.f32.partialorder %v331_v23, %v476_v33 }
 0x347   : > { %vm480_vm9 = vmand %vm474_vm11, %vm478_vm6 }
 0x348   : > { %v482_v42 = vsel %vm480_vm9, %v969_v45, %v432_v51 }
 0x3b3   : > { %v508_v31 = vpop.xlane.xlu0 %507 }
 0x3b7   : > { %v510_v35 = vpop.xlane.xlu1 %509  ;;  %v518_v36 = vpop.xlane.xlu0 %517 }
 0x3b8   : > { %v521_v39 = vadd.f32 %v518_v36, %v508_v31 }
 0x3ba   : > { %v525_v41 = vadd.f32 %v521_v39, %v475_v28 }
 0x3bb   : > { %v520_v46 = vpop.xlane.xlu1 %519 }
 0x3bc   : > { %vm527_vm10 = vcmp.lt.f32.partialorder %v331_v23, %v525_v41  ;;  %v522_v48 = vadd.f32 %v520_v46, %v510_v35 }
 0x3bd   : > { %vm529_vm12 = vmand %vm523_vm8, %vm527_vm10 }
 0x3be   : > { %v531_v26 = vsel %vm529_vm12, %v994_v63, %v481_v49  ;;  %v526_v50 = vadd.f32 %v522_v48, %v476_v33 }
 0x3bf   : > { %533 = vst [vmem:[%s200_s11] sm:$0xff] %v531_v26 }
 0x3c0   : > { %vm528_vm14 = vcmp.lt.f32.partialorder %v331_v23, %v526_v50 }
 0x3c1   : > { %vm530_vm15 = vmand %vm524_vm13, %vm528_vm14 }
 0x3c2   : > { %v532_v29 = vsel %vm530_vm15, %v998_v2, %v482_v42 }
 0x3c3   : > { %534 = vst [vmem:[%s200_s11 + $0x8] sm:$0xff] %v532_v29 }
 0x3c4   : > { %775 = shalt.err (!%p772_p5)
}
 0x3c5   : > { %s776_s30 = scalar_lea.hbm %s1037_s15, 256  ;;  %s780_s6 = scalar_lea.hbm %s1093_s3, 512 }
 0x3c6   : > { %p777_p6 = scmp.ne.s32.totalorder %s1037_s15, %s776_s30  ;;  %p781_p10 = scmp.lt.s32.totalorder %s1037_s15, %s1093_s3 }
 0x3c7   : > { %p782_p11 = scmp.lt.s32.totalorder %s780_s6, %s776_s30 }
 0x3c8   : > { %p778_p7 = pnand %p777_p6, %p905_p4 }
 0x3c9   : > { %p783_p12 = por %p782_p11, %p781_p10 }
 0x3ca   : > { %p779_p9 = pneg %p778_p7 }
 0x3cc   : > { %p784_p13 = pnand %p783_p12, %p779_p9 }
 0x3ce   : > { %787 = shalt.err (!%p784_p13)
}
 0x3cf   : > { %s843_s9 = smov 128   ;;  %s844_s10 = smov 8  }
 0x3d0   : > { %689 = dma.vmem_to_hbm [thread:$0]  (%p905_p4), %s1039_s18, 256, %s1037_s15, %s1045_s23, %s843_s9, %s843_s9, %s844_s10  }
 0x3d1 PF: > { %p695_p0 = scmp.ge.s32.totalorder %s838_s17, 2  ;;  %s564_s11 = sand.u32 1, %s818_s12  }
 0x3d2   : > { %s565_s19 = scalar_lea.sflag [#allocation3], %s564_s11 }
 0x3d3   : > { %p692_p1 = pnand %p695_p0, %p912_p8 }
 0x3d5   : > { %p693_p2 = pneg %p692_p1 }
 0x3d7   : > { %813 = dma.done.wait (%p693_p2), %s565_s19, 256  }
 0x3d8   : > { %815 = vsyncadd (%p693_p2), %s565_s19, 4294967040  ;;  %s16_s17 = sadd.s32 1, %s838_s17   ;;  %s1102_s12 = smov %s822_s13 }
 0x3d9   : > { %p13_p3 = scmp.ge.s32.totalorder %s16_s17, 4   ;;  %s1103_s13 = smov %s826_s14 }
 0x3da   : > { %s1104_s14 = smov %s918_s25  ;;  %s1105_s15 = smov %s834_s16 }
 0x3db   : > { %s1106_s16 = smov %s1108_s20  ;;  %15 = sbr.rel (!%p13_p3) target bundleno = 4 (0x4), region = 77 }
 0x3e0   :  { %570 = vsyncpa [#allocation3], 1 }
 0x3e1   :  { %572 = vsyncpa [#allocation3 + $0x1], 1 }

</bundles_post_ra>
